<compile_context>
chip_gen: v7x
topology: tpu7x:2x2x1
jax: 0.10.0
libtpu: 0.0.40
codegen_flags: <defaults>
</compile_context>

<pallas_src>
import functools

import jax
import jax.numpy as jnp
from jax import lax
from jax.experimental import pallas as pl
from jax.experimental.pallas import tpu as pltpu

LANES = 128
SUB_ROWS = 256                       # inner-chunk rows: 256x128 f32 = 128 KiB
TARGET_TILE_BYTES = 2 * 1024 * 1024  # ~2 MiB per input per grid step
MIN_KERNEL_ELEMS = 256 * 1024        # below this, pure-JAX fallback is faster


def _default_num_partitions():
    """2 megacore partitions on 2-TensorCore chips (v4/v5p/v7x), else 1."""
    try:
        kind = jax.devices()[0].device_kind.lower()
    except Exception:
        return 1
    if "lite" in kind or "v5e" in kind or "v6e" in kind:
        return 1
    if "v7" in kind or "v5p" in kind or "v4" in kind or "v5" in kind:
        return 2
    return 1


def _dice_partial_kernel(x_ref, t_ref, out_ref, *, total_rows, tile_rows,
                         steps_per_part):
    p = pl.program_id(0)
    i = pl.program_id(1)

    @pl.when(i == 0)
    def _init():
        out_ref[...] = jnp.zeros_like(out_ref)

    # Row offset this block would have had if not clamped by the index_map;
    # used both to detect boundary / duplicate blocks and for the rare mask.
    intended_block = p * steps_per_part + i
    block_row0 = intended_block * tile_rows
    needs_mask = block_row0 + tile_rows > total_rows

    sub_rows = min(SUB_ROWS, tile_rows)
    n_sub = tile_rows // sub_rows

    def accumulate(mask_rows):
        def body(c, carry):
            acc_p, acc_s = carry
            r0 = c * sub_rows
            if not isinstance(r0, int):
                r0 = pl.multiple_of(r0, sub_rows)
            x = x_ref[pl.ds(r0, sub_rows), :].astype(jnp.float32)
            t = t_ref[pl.ds(r0, sub_rows), :].astype(jnp.float32)
            if mask_rows:
                ridx = lax.broadcasted_iota(jnp.int32, (sub_rows, LANES), 0)
                valid = (block_row0 + r0 + ridx) < total_rows
                x = jnp.where(valid, x, 0.0)
                t = jnp.where(valid, t, 0.0)
            # Reshape keeps each (8,128) vreg tile intact -> axis-0 sum is
            # pure VPU adds; live range bounded to one sub-chunk.
            acc_p = acc_p + (x * t).reshape(sub_rows // 8, 8, LANES).sum(axis=0)
            acc_s = acc_s + (x + t).reshape(sub_rows // 8, 8, LANES).sum(axis=0)
            return acc_p, acc_s

        zero = jnp.zeros((8, LANES), jnp.float32)
        if n_sub == 1:
            acc_p, acc_s = body(0, (zero, zero))
        else:
            acc_p, acc_s = lax.fori_loop(0, n_sub, body, (zero, zero),
                                         unroll=True)
        out_ref[0, 0, :, :] += acc_p
        out_ref[0, 1, :, :] += acc_s

    @pl.when(jnp.logical_not(needs_mask))
    def _fast_path():          # interior blocks: no iota / compare / select
        accumulate(False)

    @pl.when(needs_mask)
    def _boundary_path():      # last real block overhang + clamped duplicates
        accumulate(True)


def _dice_from_sums(intersection, sum_xt, smooth):
    dice = (2.0 * intersection + smooth) / (sum_xt + smooth)
    return (1.0 - dice).astype(jnp.float32)


def _sums_jax(x, t):
    xf = x.astype(jnp.float32)
    tf = t.astype(jnp.float32)
    return jnp.sum(xf * tf), jnp.sum(xf) + jnp.sum(tf)


def dice_loss(inputs, targets, smooth=1.0, *, max_tile_rows=None,
              num_partitions=None, min_kernel_elems=MIN_KERNEL_ELEMS):
    """Pallas TPU implementation of DiceLoss.forward. Returns a scalar f32."""
    x = jnp.ravel(inputs)           # native dtype -- no wrapper-side f32 copy
    t = jnp.ravel(targets)
    n = x.shape[0]
    if t.shape[0] != n:
        raise ValueError("inputs and targets must have the same number of "
                         f"elements, got {n} vs {t.shape[0]}")

    # Small inputs: pallas_call launch + grid overhead dominates -> fused XLA.
    if n < max(int(min_kernel_elems), 8 * LANES):
        inter, sum_xt = _sums_jax(x, t)
        return _dice_from_sums(inter, sum_xt, smooth)

    # Kernel covers the 1024-aligned prefix (free reshape to (rows,128)); the
    # <1024-element tail is one vreg of work, folded in below with plain jnp.
    n_main = (n // (8 * LANES)) * (8 * LANES)
    rows = n_main // LANES                       # multiple of 8

    if n_main == n:
        x_main, t_main = x, t
        tail = None
    else:
        # TODO(synk): XLA may materialize a copy for this prefix slice; still
        # cheaper than padding both full inputs, and only hits sizes that are
        # not a multiple of 1024 elements.
        x_main, t_main = x[:n_main], t[:n_main]
        x_tail = x[n_main:].astype(jnp.float32)
        t_tail = t[n_main:].astype(jnp.float32)
        tail = (jnp.sum(x_tail * t_tail), jnp.sum(x_tail) + jnp.sum(t_tail))

    x2 = x_main.reshape(rows, LANES)
    t2 = t_main.reshape(rows, LANES)

    # Dtype-aware tile size: ~TARGET_TILE_BYTES per input per step (4096 f32
    # rows / 8192 bf16 rows). 2 inputs x 2 pipeline buffers stays well under
    # every generation's default scoped-VMEM limit.
    itemsize = max(jnp.dtype(x.dtype).itemsize, jnp.dtype(t.dtype).itemsize)
    tile_rows = TARGET_TILE_BYTES // (LANES * itemsize)
    if max_tile_rows is not None:
        tile_rows = min(tile_rows, int(max_tile_rows))
    tile_rows = max(8, min(tile_rows, rows))
    if tile_rows > SUB_ROWS:
        tile_rows = (tile_rows // SUB_ROWS) * SUB_ROWS
    else:
        tile_rows = (tile_rows // 8) * 8
    num_blocks = pl.cdiv(rows, tile_rows)

    # Megacore split only where there are 2 TensorCores; on single-TC chips a
    # second partition only costs a wasted duplicate-block DMA.
    num_parts = (_default_num_partitions() if num_partitions is None
                 else int(num_partitions))
    num_parts = max(1, min(num_parts, num_blocks))
    steps_per_part = pl.cdiv(num_blocks, num_parts)
    last_block = num_blocks - 1

    def in_index_map(p, i):
        # Clamp so DMAs never start past the end of the array; clamped
        # duplicate blocks are fully masked in-kernel.
        return (jnp.minimum(p * steps_per_part + i, last_block), 0)

    kernel = functools.partial(_dice_partial_kernel, total_rows=rows,
                               tile_rows=tile_rows,
                               steps_per_part=steps_per_part)

    partials = pl.pallas_call(
        kernel,
        out_shape=jax.ShapeDtypeStruct((num_parts, 2, 8, LANES), jnp.float32),
        grid_spec=pltpu.PrefetchScalarGridSpec(
            num_scalar_prefetch=0,
            grid=(num_parts, steps_per_part),
            in_specs=[
                pl.BlockSpec((tile_rows, LANES), in_index_map),
                pl.BlockSpec((tile_rows, LANES), in_index_map),
            ],
            out_specs=pl.BlockSpec((1, 2, 8, LANES),
                                   lambda p, i: (p, 0, 0, 0)),
        ),
        compiler_params=pltpu.CompilerParams(
            dimension_semantics=("parallel", "arbitrary")),
    )(x2, t2)

    # Tiny wrapper-side combine: one cross-lane reduce over 2*num_parts vregs.
    intersection = jnp.sum(partials[:, 0])
    sum_xt = jnp.sum(partials[:, 1])
    if tail is not None:
        intersection = intersection + tail[0]
        sum_xt = sum_xt + tail[1]
    return _dice_from_sums(intersection, sum_xt, smooth)


def _dice_loss_ref(inputs, targets, smooth=1.0):
    x = jnp.ravel(inputs).astype(jnp.float32)
    t = jnp.ravel(targets).astype(jnp.float32)
    intersection = jnp.sum(x * t)
    dice = (2.0 * intersection + smooth) / (jnp.sum(x) + jnp.sum(t) + smooth)
    return 1.0 - dice


if __name__ == "__main__":
    key = jax.random.PRNGKey(0)
    keys = jax.random.split(key, 8)

    def check(name, loss, ref, atol=1e-5, rtol=1e-5):
        loss = jax.block_until_ready(loss)
        assert jnp.allclose(loss, ref, atol=atol, rtol=rtol), (name, loss, ref)

    # 1) NCHW-style inputs, exact multiple of 1024 elements, single block.
    shape = (2, 4, 16, 16)
    x1 = jax.nn.sigmoid(jax.random.normal(keys[0], shape, dtype=jnp.float32))
    t1 = (jax.random.uniform(keys[1], shape) > 0.5).astype(jnp.float32)
    check("basic", dice_loss(x1, t1, smooth=1.0, min_kernel_elems=0),
          _dice_loss_ref(x1, t1))

    # 2) Ragged total size (not a multiple of 1024): kernel on the aligned
    #    prefix, <1024-element tail folded in with jnp (no full-array pad).
    shape2 = (3, 5, 37, 41)
    x2 = jax.nn.sigmoid(jax.random.normal(keys[2], shape2, dtype=jnp.float32))
    t2 = (jax.random.uniform(keys[3], shape2) > 0.5).astype(jnp.float32)
    check("ragged", dice_loss(x2, t2, smooth=1.0, min_kernel_elems=0),
          _dice_loss_ref(x2, t2))

    # 3) Tiny tile + forced 2 partitions: multi-block grid with a clamped
    #    duplicate block that must be fully masked out.
    shape3 = (2, 4, 16, 24)
    x3 = jax.nn.sigmoid(jax.random.normal(keys[4], shape3, dtype=jnp.float32))
    t3 = (jax.random.uniform(keys[5], shape3) > 0.5).astype(jnp.float32)
    check("dup_block",
          dice_loss(x3, t3, smooth=1.0, min_kernel_elems=0,
                    max_tile_rows=8, num_partitions=2),
          _dice_loss_ref(x3, t3))

    # 4) Multi-block grid with a boundary (overhang) block and a multi-chunk
    #    inner fori_loop.
    shape4 = (3, 4, 100, 128)   # 153600 elements -> 1200 rows of 128 lanes
    x4 = jax.nn.sigmoid(jax.random.normal(keys[6], shape4, dtype=jnp.float32))
    t4 = (jax.random.uniform(keys[7], shape4) > 0.5).astype(jnp.float32)
    check("edge_block",
          dice_loss(x4, t4, smooth=1.0, min_kernel_elems=0,
                    max_tile_rows=1024),
          _dice_loss_ref(x4, t4))

    # 5) Native bf16 inputs pass straight through (half the HBM bytes).
    x5 = x1.astype(jnp.bfloat16)
    check("bf16", dice_loss(x5, t1, smooth=1.0, min_kernel_elems=0),
          _dice_loss_ref(x5, t1))

    # 6) Small-input pure-JAX fallback (default threshold).
    check("fallback", dice_loss(x1, t1, smooth=1.0), _dice_loss_ref(x1, t1))

    print("KERNEL_OK")
</pallas_src>

<mosaic_0001>
module attributes {stable_mosaic.version = 11 : i64} {
  func.func @_dice_partial_kernel(%arg0: i32, %arg1: i32, %arg2: memref<16x128xf32, #tpu.memory_space<vmem>>, %arg3: memref<16x128xf32, #tpu.memory_space<vmem>>, %arg4: memref<1x2x8x128xf32, #tpu.memory_space<vmem>>) attributes {dimension_semantics = [#tpu.dimension_semantics<parallel>, #tpu.dimension_semantics<arbitrary>], iteration_bounds = array<i64: 1, 1>, scalar_prefetch = 0 : i64, scratch_operands = 0 : i64, tpu.core_type = #tpu.core_type<tc>, window_params = [{transform_indices = @transform_0, window_bounds = array<i64: 16, 128>}, {transform_indices = @transform_1, window_bounds = array<i64: 16, 128>}, {transform_indices = @transform_2, window_bounds = array<i64: 1, 2, 8, 128>}]} {
    %c0_i32 = arith.constant 0 : i32
    %0 = arith.cmpi eq, %arg1, %c0_i32 : i32
    %1 = arith.extui %0 : i1 to i32
    %c0_i32_0 = arith.constant 0 : i32
    %2 = arith.cmpi ne, %1, %c0_i32_0 : i32
    scf.if %2 {
      %cst = arith.constant 0.000000e+00 : f32
      %13 = vector.broadcast %cst : f32 to vector<1x2x8x128xf32>
      %c0 = arith.constant 0 : index
      %c0_5 = arith.constant 0 : index
      %c0_6 = arith.constant 0 : index
      %c0_7 = arith.constant 0 : index
      %14 = vector.load %arg4[%c0, %c0_5, %c0_6, %c0_7] : memref<1x2x8x128xf32, #tpu.memory_space<vmem>>, vector<1x2x8x128xf32>
      tpu.vector_store %arg4[%c0, %c0_5, %c0_6, %c0_7], %13 {strides = array<i32>} : memref<1x2x8x128xf32, #tpu.memory_space<vmem>>, vector<1x2x8x128xf32>,
    } else {
    }
    %c1_i32 = arith.constant 1 : i32
    %3 = arith.muli %arg0, %c1_i32 : i32
    %4 = arith.addi %3, %arg1 : i32
    %c16_i32 = arith.constant 16 : i32
    %5 = arith.muli %4, %c16_i32 : i32
    %c16_i32_1 = arith.constant 16 : i32
    %6 = arith.addi %5, %c16_i32_1 : i32
    %c16_i32_2 = arith.constant 16 : i32
    %7 = arith.cmpi sgt, %6, %c16_i32_2 : i32
    %true = arith.constant true
    %8 = arith.xori %7, %true : i1
    %9 = arith.extui %8 : i1 to i32
    %c0_i32_3 = arith.constant 0 : i32
    %10 = arith.cmpi ne, %9, %c0_i32_3 : i32
    scf.if %10 {
      %cst = arith.constant 0.000000e+00 : f32
      %13 = vector.broadcast %cst : f32 to vector<8x128xf32>
      %c0 = arith.constant 0 : index
      %c0_5 = arith.constant 0 : index
      %14 = vector.load %arg2[%c0, %c0_5] : memref<16x128xf32, #tpu.memory_space<vmem>>, vector<16x128xf32>
      %c0_6 = arith.constant 0 : index
      %c0_7 = arith.constant 0 : index
      %15 = vector.load %arg3[%c0_6, %c0_7] : memref<16x128xf32, #tpu.memory_space<vmem>>, vector<16x128xf32>
      %16 = arith.mulf %14, %15 : vector<16x128xf32>
      %17 = vector.shape_cast %16 : vector<16x128xf32> to vector<2x8x128xf32>
      %cst_8 = arith.constant dense<0.000000e+00> : vector<8x128xf32>
      %18 = vector.multi_reduction <add>, %17, %cst_8 [0] : vector<2x8x128xf32> to vector<8x128xf32>
      %19 = arith.addf %13, %18 : vector<8x128xf32>
      %20 = arith.addf %14, %15 : vector<16x128xf32>
      %21 = vector.shape_cast %20 : vector<16x128xf32> to vector<2x8x128xf32>
      %cst_9 = arith.constant dense<0.000000e+00> : vector<8x128xf32>
      %22 = vector.multi_reduction <add>, %21, %cst_9 [0] : vector<2x8x128xf32> to vector<8x128xf32>
      %23 = arith.addf %13, %22 : vector<8x128xf32>
      %c0_10 = arith.constant 0 : index
      %c0_11 = arith.constant 0 : index
      %c0_12 = arith.constant 0 : index
      %c0_13 = arith.constant 0 : index
      %24 = vector.load %arg4[%c0_10, %c0_11, %c0_12, %c0_13] : memref<1x2x8x128xf32, #tpu.memory_space<vmem>>, vector<1x1x8x128xf32>
      %25 = vector.shape_cast %24 : vector<1x1x8x128xf32> to vector<8x128xf32>
      %26 = arith.addf %25, %19 : vector<8x128xf32>
      %c0_14 = arith.constant 0 : index
      %c0_15 = arith.constant 0 : index
      %c0_16 = arith.constant 0 : index
      %c0_17 = arith.constant 0 : index
      %27 = vector.load %arg4[%c0_14, %c0_15, %c0_16, %c0_17] : memref<1x2x8x128xf32, #tpu.memory_space<vmem>>, vector<1x1x8x128xf32>
      %28 = vector.shape_cast %27 : vector<1x1x8x128xf32> to vector<8x128xf32>
      %29 = vector.shape_cast %26 : vector<8x128xf32> to vector<1x1x8x128xf32>
      tpu.vector_store %arg4[%c0_14, %c0_15, %c0_16, %c0_17], %29 {strides = array<i32>} : memref<1x2x8x128xf32, #tpu.memory_space<vmem>>, vector<1x1x8x128xf32>,
      %c0_18 = arith.constant 0 : index
      %c1 = arith.constant 1 : index
      %c0_19 = arith.constant 0 : index
      %c0_20 = arith.constant 0 : index
      %30 = vector.load %arg4[%c0_18, %c1, %c0_19, %c0_20] : memref<1x2x8x128xf32, #tpu.memory_space<vmem>>, vector<1x1x8x128xf32>
      %31 = vector.shape_cast %30 : vector<1x1x8x128xf32> to vector<8x128xf32>
      %32 = arith.addf %31, %23 : vector<8x128xf32>
      %c0_21 = arith.constant 0 : index
      %c1_22 = arith.constant 1 : index
      %c0_23 = arith.constant 0 : index
      %c0_24 = arith.constant 0 : index
      %33 = vector.load %arg4[%c0_21, %c1_22, %c0_23, %c0_24] : memref<1x2x8x128xf32, #tpu.memory_space<vmem>>, vector<1x1x8x128xf32>
      %34 = vector.shape_cast %33 : vector<1x1x8x128xf32> to vector<8x128xf32>
      %35 = vector.shape_cast %32 : vector<8x128xf32> to vector<1x1x8x128xf32>
      tpu.vector_store %arg4[%c0_21, %c1_22, %c0_23, %c0_24], %35 {strides = array<i32>} : memref<1x2x8x128xf32, #tpu.memory_space<vmem>>, vector<1x1x8x128xf32>,
    } else {
    }
    %11 = arith.extui %7 : i1 to i32
    %c0_i32_4 = arith.constant 0 : i32
    %12 = arith.cmpi ne, %11, %c0_i32_4 : i32
    scf.if %12 {
      %cst = arith.constant 0.000000e+00 : f32
      %13 = vector.broadcast %cst : f32 to vector<8x128xf32>
      %c0 = arith.constant 0 : index
      %c0_5 = arith.constant 0 : index
      %14 = vector.load %arg2[%c0, %c0_5] : memref<16x128xf32, #tpu.memory_space<vmem>>, vector<16x128xf32>
      %c0_6 = arith.constant 0 : index
      %c0_7 = arith.constant 0 : index
      %15 = vector.load %arg3[%c0_6, %c0_7] : memref<16x128xf32, #tpu.memory_space<vmem>>, vector<16x128xf32>
      %16 = tpu.iota {dimensions = array<i32: 0>} : vector<16x128xi32>
      %c0_i32_8 = arith.constant 0 : i32
      %17 = arith.addi %5, %c0_i32_8 : i32
      %18 = vector.broadcast %17 : i32 to vector<16x128xi32>
      %19 = arith.addi %18, %16 : vector<16x128xi32>
      %c16_i32_9 = arith.constant 16 : i32
      %20 = vector.broadcast %c16_i32_9 : i32 to vector<16x128xi32>
      %21 = arith.cmpi slt, %19, %20 : vector<16x128xi32>
      %cst_10 = arith.constant 0.000000e+00 : f32
      %22 = vector.broadcast %cst_10 : f32 to vector<16x128xf32>
      %23 = arith.select %21, %14, %22 : vector<16x128xi1>, vector<16x128xf32>
      %cst_11 = arith.constant 0.000000e+00 : f32
      %24 = vector.broadcast %cst_11 : f32 to vector<16x128xf32>
      %25 = arith.select %21, %15, %24 : vector<16x128xi1>, vector<16x128xf32>
      %26 = arith.mulf %23, %25 : vector<16x128xf32>
      %27 = vector.shape_cast %26 : vector<16x128xf32> to vector<2x8x128xf32>
      %cst_12 = arith.constant dense<0.000000e+00> : vector<8x128xf32>
      %28 = vector.multi_reduction <add>, %27, %cst_12 [0] : vector<2x8x128xf32> to vector<8x128xf32>
      %29 = arith.addf %13, %28 : vector<8x128xf32>
      %30 = arith.addf %23, %25 : vector<16x128xf32>
      %31 = vector.shape_cast %30 : vector<16x128xf32> to vector<2x8x128xf32>
      %cst_13 = arith.constant dense<0.000000e+00> : vector<8x128xf32>
      %32 = vector.multi_reduction <add>, %31, %cst_13 [0] : vector<2x8x128xf32> to vector<8x128xf32>
      %33 = arith.addf %13, %32 : vector<8x128xf32>
      %c0_14 = arith.constant 0 : index
      %c0_15 = arith.constant 0 : index
      %c0_16 = arith.constant 0 : index
      %c0_17 = arith.constant 0 : index
      %34 = vector.load %arg4[%c0_14, %c0_15, %c0_16, %c0_17] : memref<1x2x8x128xf32, #tpu.memory_space<vmem>>, vector<1x1x8x128xf32>
      %35 = vector.shape_cast %34 : vector<1x1x8x128xf32> to vector<8x128xf32>
      %36 = arith.addf %35, %29 : vector<8x128xf32>
      %c0_18 = arith.constant 0 : index
      %c0_19 = arith.constant 0 : index
      %c0_20 = arith.constant 0 : index
      %c0_21 = arith.constant 0 : index
      %37 = vector.load %arg4[%c0_18, %c0_19, %c0_20, %c0_21] : memref<1x2x8x128xf32, #tpu.memory_space<vmem>>, vector<1x1x8x128xf32>
      %38 = vector.shape_cast %37 : vector<1x1x8x128xf32> to vector<8x128xf32>
      %39 = vector.shape_cast %36 : vector<8x128xf32> to vector<1x1x8x128xf32>
      tpu.vector_store %arg4[%c0_18, %c0_19, %c0_20, %c0_21], %39 {strides = array<i32>} : memref<1x2x8x128xf32, #tpu.memory_space<vmem>>, vector<1x1x8x128xf32>,
      %c0_22 = arith.constant 0 : index
      %c1 = arith.constant 1 : index
      %c0_23 = arith.constant 0 : index
      %c0_24 = arith.constant 0 : index
      %40 = vector.load %arg4[%c0_22, %c1, %c0_23, %c0_24] : memref<1x2x8x128xf32, #tpu.memory_space<vmem>>, vector<1x1x8x128xf32>
      %41 = vector.shape_cast %40 : vector<1x1x8x128xf32> to vector<8x128xf32>
      %42 = arith.addf %41, %33 : vector<8x128xf32>
      %c0_25 = arith.constant 0 : index
      %c1_26 = arith.constant 1 : index
      %c0_27 = arith.constant 0 : index
      %c0_28 = arith.constant 0 : index
      %43 = vector.load %arg4[%c0_25, %c1_26, %c0_27, %c0_28] : memref<1x2x8x128xf32, #tpu.memory_space<vmem>>, vector<1x1x8x128xf32>
      %44 = vector.shape_cast %43 : vector<1x1x8x128xf32> to vector<8x128xf32>
      %45 = vector.shape_cast %42 : vector<8x128xf32> to vector<1x1x8x128xf32>
      tpu.vector_store %arg4[%c0_25, %c1_26, %c0_27, %c0_28], %45 {strides = array<i32>} : memref<1x2x8x128xf32, #tpu.memory_space<vmem>>, vector<1x1x8x128xf32>,
    } else {
    }
    return
  }
  func.func @transform_0(%arg0: i32, %arg1: i32) -> (i32, i32) {
    %c1_i32 = arith.constant 1 : i32
    %0 = arith.muli %arg0, %c1_i32 : i32
    %1 = arith.addi %0, %arg1 : i32
    %c0_i32 = arith.constant 0 : i32
    %2 = arith.minsi %1, %c0_i32 : i32
    %c0_i32_0 = arith.constant 0 : i32
    %c0_i32_1 = arith.constant 0 : i32
    return %2, %c0_i32_0 : i32, i32
  }
  func.func @transform_1(%arg0: i32, %arg1: i32) -> (i32, i32) {
    %c1_i32 = arith.constant 1 : i32
    %0 = arith.muli %arg0, %c1_i32 : i32
    %1 = arith.addi %0, %arg1 : i32
    %c0_i32 = arith.constant 0 : i32
    %2 = arith.minsi %1, %c0_i32 : i32
    %c0_i32_0 = arith.constant 0 : i32
    %c0_i32_1 = arith.constant 0 : i32
    return %2, %c0_i32_0 : i32, i32
  }
  func.func @transform_2(%arg0: i32, %arg1: i32) -> (i32, i32, i32, i32) {
    %c0_i32 = arith.constant 0 : i32
    %c0_i32_0 = arith.constant 0 : i32
    %c0_i32_1 = arith.constant 0 : i32
    %c0_i32_2 = arith.constant 0 : i32
    return %arg0, %c0_i32, %c0_i32_0, %c0_i32_1 : i32, i32, i32, i32
  }
}

</mosaic_0001>

<bundles_post_ra>
// kernel: tpu_custom_call.1
= control target key start
LH: loop header
LB: loop body
LE: loop exit
PB: predicated region body
PF: predicated region fallthrough
CT: control target
= control target key end

     0   :  { %7 = vsyncpa [#allocation3], 0  ;;  %s292_s0 = inlined_call_operand.hbm [shape: f32[16,128], index: 0, kind: input, shape index: {}]   ;;  %s293_s1 = inlined_call_operand.hbm [shape: f32[16,128], index: 1, kind: input, shape index: {}]   ;;  %s294_s2 = inlined_call_operand.hbm [shape: f32[1,2,8,128], index: 2, kind: output, shape index: {}]  }
   0x1   :  { %8 = vsyncpa [#allocation6], 0 }
   0x2   :  { %9 = vsyncpa [#allocation4], 0  ;;  %s227_s9 = smov [#allocation2]   ;;  %s155_s13 = scalar_lea.hbm %s292_s0, 256 }
   0x3   :  { %s21_s10 = sshll.u32 %s227_s9, 4  ;;  %p156_p0 = scmp.ne.s32.totalorder %s292_s0, %s155_s13  ;;  %s22_s10 = int_to_ptr.vmem [resolvable:$true] %s21_s10 }
   0x4   :  { %p159_p1 = scmp.lt.u32.totalorder %s155_s13, %s292_s0 }
   0x6   :  { %p161_p2 = pnand %p159_p1, %p156_p0 }
   0x8   :  { %164 = shalt.err (!%p161_p2)
}
   0x9   :  { %s165_s18 = scalar_lea.vmem %s22_s10, 256  ;;  %p170_p4 = scmp.lt.s32.totalorder %s22_s10, %s22_s10 }
   0xa   :  { %p166_p3 = scmp.ne.s32.totalorder %s22_s10, %s165_s18  ;;  %p171_p5 = scmp.lt.s32.totalorder %s165_s18, %s165_s18 }
   0xc   :  { %p172_p6 = por %p171_p5, %p170_p4 }
   0xe   :  { %p173_p7 = pnand %p172_p6, %p166_p3 }
  0x10   :  { %176 = shalt.err (!%p173_p7)
}
  0x11   :  { %s228_s19 = smov 128   ;;  %s229_s20 = smov 8  }
  0x12   :  { %27 = dma.hbm_to_vmem [thread:$0]  %s292_s0, 256, %s22_s10, [#allocation3], %s228_s19, %s228_s19, %s229_s20  }
  0x13   :  { %s230_s23 = smov [#allocation5]   ;;  %s177_s27 = scalar_lea.hbm %s293_s1, 256 }
  0x14   :  { %s39_s24 = sshll.u32 %s230_s23, 4  ;;  %p178_p8 = scmp.ne.s32.totalorder %s293_s1, %s177_s27  ;;  %s40_s24 = int_to_ptr.vmem [resolvable:$true] %s39_s24 }
  0x15   :  { %p181_p9 = scmp.lt.u32.totalorder %s177_s27, %s293_s1 }
  0x17   :  { %p183_p10 = pnand %p181_p9, %p178_p8 }
  0x19   :  { %186 = shalt.err (!%p183_p10)
}
  0x1a   :  { %s187_s4 = scalar_lea.vmem %s40_s24, 256  ;;  %p192_p12 = scmp.lt.s32.totalorder %s40_s24, %s40_s24 }
  0x1b   :  { %p188_p11 = scmp.ne.s32.totalorder %s40_s24, %s187_s4  ;;  %p193_p13 = scmp.lt.s32.totalorder %s187_s4, %s187_s4 }
  0x1d   :  { %p194_p0 = por %p193_p13, %p192_p12 }
  0x1f   :  { %p195_p1 = pnand %p194_p0, %p188_p11 }
  0x21   :  { %198 = shalt.err (!%p195_p1)
}
  0x22   :  { %45 = dma.hbm_to_vmem [thread:$0]  %s293_s1, 256, %s40_s24, [#allocation6], %s228_s19, %s228_s19, %s229_s20  }
  0x23   :  { %221 = dma.done.wait [#allocation3], 256  }
  0x24   :  { %222 = vsyncadd [#allocation3], 4294967040 }
  0x25   :  { %223 = dma.done.wait [#allocation6], 256  }
  0x26   :  { %224 = vsyncadd [#allocation6], 4294967040  ;;  %v74_v0 = vld [vmem:[#allocation2] sm:$0xff]  ;;  %v75_v1 = vld [vmem:[#allocation2 + $0x8] sm:$0xff]  ;;  %s231_s6 = smov [#allocation7]  }
  0x27   :  { %v76_v2 = vld [vmem:[#allocation5] sm:$0xff]  ;;  %v77_v3 = vld [vmem:[#allocation5 + $0x8] sm:$0xff]  ;;  %s132_s7 = sshll.u32 %s231_s6, 4  ;;  %s133_s7 = int_to_ptr.vmem [resolvable:$true] %s132_s7 }
  0x28   :  { %v78_v4 = vmul.f32 %v76_v2, %v74_v0  ;;  %v82_v5 = vadd.f32 %v76_v2, %v74_v0  ;;  %v79_v6 = vmul.f32 %v77_v3, %v75_v1  ;;  %v83_v7 = vadd.f32 %v77_v3, %v75_v1  ;;  %s199_s1 = scalar_lea.vmem %s133_s7, 256  ;;  %p204_p3 = scmp.lt.s32.totalorder %s133_s7, %s133_s7 }
  0x29   :  { %p200_p2 = scmp.ne.s32.totalorder %s133_s7, %s199_s1  ;;  %p205_p4 = scmp.lt.s32.totalorder %s199_s1, %s199_s1 }
  0x2a   :  { %v80_v8 = vadd.f32 %v79_v6, %v78_v4  ;;  %v84_v9 = vadd.f32 %v83_v7, %v82_v5 }
  0x2b   :  { %p206_p5 = por %p205_p4, %p204_p3 }
  0x2c   :  { %88 = vst [vmem:[#allocation7] sm:$0xff] %v80_v8  ;;  %92 = vst [vmem:[#allocation7 + $0x8] sm:$0xff] %v84_v9 }
  0x2d   :  { %p207_p6 = pnand %p206_p5, %p200_p2 }
  0x2f   :  { %210 = shalt.err (!%p207_p6)
}
  0x30   :  { %s211_s10 = scalar_lea.hbm %s294_s2, 256 }
  0x31   :  { %p212_p7 = scmp.ne.s32.totalorder %s294_s2, %s211_s10  ;;  %p215_p8 = scmp.lt.u32.totalorder %s211_s10, %s294_s2 }
  0x33   :  { %p217_p9 = pnand %p215_p8, %p212_p7 }
  0x35   :  { %220 = shalt.err (!%p217_p9)
}
  0x36   :  { %138 = dma.vmem_to_hbm [thread:$0]  %s133_s7, 256, %s294_s2, [#allocation4], %s228_s19, %s228_s19, %s229_s20  }
  0x37   :  { %225 = dma.done.wait [#allocation4], 256  }
  0x38   :  { %226 = vsyncadd [#allocation4], 4294967040 }
  0x39   :  { %142 = vsyncpa [#allocation3], 1 }
  0x3a   :  { %143 = vsyncpa [#allocation6], 1 }
  0x3b   :  { %144 = vsyncpa [#allocation4], 1 }

</bundles_post_ra>
